<compile_context>
chip_gen: v6e
topology: v6e:2x2x1
jax: 0.10.0
libtpu: 0.0.40
codegen_flags: <defaults>
</compile_context>

<pallas_src>
import jax
import jax.numpy as jnp
from jax.experimental import pallas as pl
from jax.experimental.pallas import tpu as pltpu

_LANE = 128
_DEFAULT_BLOCK_BYTES = 4 << 20   # v5e / v6e: ~4 MiB row tiles
_V7X_BLOCK_BYTES = 8 << 20       # v7x: ~8 MiB row tiles (3.2 TB/s per TC)


def _identity_kernel(x_ref, o_ref):
    # Full-tile copy: lane-dense, unmasked vector stores.
    o_ref[...] = x_ref[...]


def _tpu_defaults():
    """(target_block_bytes, num_tensorcores) with safe fallbacks."""
    block_bytes = _DEFAULT_BLOCK_BYTES
    num_cores = 1
    try:
        info = pltpu.get_tpu_info()
        cores = (getattr(info, "num_cores", None)
                 or getattr(info, "tensorcores_per_chip", None)
                 or getattr(info, "num_tensorcores", None))
        if cores:
            num_cores = int(cores)
        vmem = getattr(info, "vmem_capacity_bytes", None)
        # v7x-class part: 64 MiB VMEM per TC, 2 TCs, highest HBM BW.
        if vmem is not None and vmem <= (80 << 20):
            block_bytes = _V7X_BLOCK_BYTES
            num_cores = max(num_cores, 2)
    except Exception:
        pass  # unknown backend / interpret mode: keep conservative defaults
    return block_bytes, num_cores


def _sublane_align(itemsize):
    # Native packed tiles: (8,128) for 32-bit, (16,128) bf16, (32,128) int8/fp8.
    return 8 * max(1, 4 // max(1, itemsize))


def _lane_dense_shape(total, itemsize):
    """Pick (padded_total, rows, cols, sub): cols a wide multiple of 128 lanes,
    rows a multiple of the dtype's sublane pack factor (pad with zeros)."""
    sub = _sublane_align(itemsize)
    for cols in (2048, 1024, 512, 256, _LANE):
        chunk = sub * cols
        if total >= chunk:
            padded = -(-total // chunk) * chunk
            return padded, padded // cols, cols, sub
    chunk = sub * _LANE
    padded = -(-total // chunk) * chunk
    return padded, padded // _LANE, _LANE, sub


def _row_tile(rows, cols, itemsize, sub, block_bytes, num_cores, total_bytes):
    """Row tile sized to ~block_bytes, dtype-aware sublane-aligned."""
    row_bytes = cols * itemsize
    tile = max(sub, (block_bytes // row_bytes) // sub * sub)
    if tile >= rows:
        tile = rows
        # 2-way split only when 2 TensorCores exist and each half is big
        # enough to amortize the ~0.35us per-grid-step overhead.
        if (num_cores >= 2 and total_bytes >= (2 << 20)
                and rows % (2 * sub) == 0):
            tile = rows // 2
        return tile
    # Prefer a divisor of rows so there is no ragged / masked tail block.
    t = tile
    for _ in range(64):
        if rows % t == 0:
            return t
        t -= sub
        if t < sub:
            break
    return tile


def _pallas_identity_copy(x):
    """Copy `x` into a fresh HBM buffer via a lane-dense Pallas pipeline."""
    orig_shape = x.shape
    itemsize = jnp.dtype(x.dtype).itemsize
    total = x.size
    total_bytes = total * itemsize

    padded, rows, cols, sub = _lane_dense_shape(total, itemsize)
    flat = x.reshape(-1)
    if padded != total:
        flat = jnp.pad(flat, (0, padded - total))
    x2d = flat.reshape(rows, cols)

    block_bytes, num_cores = _tpu_defaults()
    tile_rows = _row_tile(rows, cols, itemsize, sub, block_bytes, num_cores,
                          total_bytes)
    grid = (pl.cdiv(rows, tile_rows),)

    # Right-size the scoped VMEM limit: 2 operands x 2 pipeline buffers of the
    # chosen block, plus slack.  No blanket 48 MiB reservation.
    block_actual = tile_rows * cols * itemsize
    vmem_limit = int(min(max(4 * block_actual + (2 << 20), 16 << 20), 48 << 20))

    out2d = pl.pallas_call(
        _identity_kernel,
        out_shape=jax.ShapeDtypeStruct((rows, cols), x2d.dtype),
        grid=grid,
        in_specs=[pl.BlockSpec((tile_rows, cols), lambda i: (i, 0))],
        out_specs=pl.BlockSpec((tile_rows, cols), lambda i: (i, 0)),
        # No input_output_aliases: the input is not donated, so aliasing would
        # only force XLA to insert a defensive copy (2x HBM traffic).
        compiler_params=pltpu.CompilerParams(
            dimension_semantics=("parallel",),
            vmem_limit_bytes=vmem_limit,
        ),
    )(x2d)

    out = out2d.reshape(-1)
    if padded != total:
        out = out[:total]
    return out.reshape(orig_shape)


class Generator:
    """JAX/Pallas equivalent of the PyTorch Generator (identity forward)."""

    def __init__(self, euclidean_dim, label_dim, output_dim):
        # The reference module has no parameters.
        self.euclidean_dim = euclidean_dim
        self.label_dim = label_dim
        self.output_dim = output_dim

    def __call__(self, x, force_kernel=False):
        return self.forward(x, force_kernel=force_kernel)

    def forward(self, x, force_kernel=False):
        x = jnp.asarray(x)
        if x.size == 0:
            return x
        if not force_kernel:
            # forward(x) -> x: the optimal implementation is no kernel at all
            # (zero HBM traffic, zero launch overhead), matching the PyTorch
            # module which returns the input tensor unchanged.
            return x
        # Explicitly requested fresh-buffer copy via the Pallas kernel.
        return _pallas_identity_copy(x)


if __name__ == "__main__":
    key = jax.random.PRNGKey(0)
    # Small NCHW-style input consistent with a GAN generator's data tensor.
    x = jax.random.normal(key, (2, 4, 16, 16), dtype=jnp.float32)

    gen = Generator(euclidean_dim=32, label_dim=4, output_dim=16 * 16)

    # Default path: true identity (kernel elided).
    y_fast = gen(x)
    # Forced path: exercise the Pallas copy kernel once on TPU.
    y_kern = gen.forward(x, force_kernel=True)
    jax.block_until_ready((y_fast, y_kern))

    assert y_fast.shape == x.shape and y_fast.dtype == x.dtype
    assert y_kern.shape == x.shape and y_kern.dtype == x.dtype
    assert bool(jnp.array_equal(y_fast, x))
    assert bool(jnp.array_equal(y_kern, x))

    print("KERNEL_OK")
</pallas_src>

<mosaic_0001>
module attributes {stable_mosaic.version = 11 : i64} {
  func.func @_identity_kernel(%arg0: i32, %arg1: memref<8x256xf32, #tpu.memory_space<vmem>>, %arg2: memref<8x256xf32, #tpu.memory_space<vmem>>) attributes {dimension_semantics = [#tpu.dimension_semantics<parallel>], iteration_bounds = array<i64: 1>, scalar_prefetch = 0 : i64, scratch_operands = 0 : i64, tpu.core_type = #tpu.core_type<tc>, window_params = [{transform_indices = @transform_0, window_bounds = array<i64: 8, 256>}, {transform_indices = @transform_1, window_bounds = array<i64: 8, 256>}]} {
    %c0 = arith.constant 0 : index
    %c0_0 = arith.constant 0 : index
    %0 = vector.load %arg1[%c0, %c0_0] : memref<8x256xf32, #tpu.memory_space<vmem>>, vector<8x256xf32>
    %c0_1 = arith.constant 0 : index
    %c0_2 = arith.constant 0 : index
    %1 = vector.load %arg2[%c0_1, %c0_2] : memref<8x256xf32, #tpu.memory_space<vmem>>, vector<8x256xf32>
    tpu.vector_store %arg2[%c0_1, %c0_2], %0 {strides = array<i32>} : memref<8x256xf32, #tpu.memory_space<vmem>>, vector<8x256xf32>,
    return
  }
  func.func @transform_0(%arg0: i32) -> (i32, i32) {
    %c0_i32 = arith.constant 0 : i32
    %c0_i32_0 = arith.constant 0 : i32
    return %arg0, %c0_i32 : i32, i32
  }
  func.func @transform_1(%arg0: i32) -> (i32, i32) {
    %c0_i32 = arith.constant 0 : i32
    %c0_i32_0 = arith.constant 0 : i32
    return %arg0, %c0_i32 : i32, i32
  }
}

</mosaic_0001>

<bundles_post_ra>
// kernel: tpu_custom_call.1
= control target key start
LH: loop header
LB: loop body
LE: loop exit
PB: predicated region body
PF: predicated region fallthrough
CT: control target
= control target key end

     0   :  { %6 = vsyncpa [#allocation3], 0  ;;  %s104_s0 = inlined_call_operand.hbm [shape: f32[8,256], index: 0, kind: input, shape index: {}]   ;;  %s105_s1 = inlined_call_operand.hbm [shape: f32[8,256], index: 1, kind: output, shape index: {}]  }
   0x1   :  { %7 = vsyncpa [#allocation4], 0  ;;  %s86_s6 = smov [#allocation2]  }
   0x2   :  { %s14_s7 = sshll.u32 %s86_s6, 4  ;;  %s15_s7 = int_to_ptr.vmem [resolvable:$true] %s14_s7 }
   0x3   :  { %s50_s8 = scalar_lea.vmem %s15_s7, 256  ;;  %p55_p1 = scmp.lt.s32.totalorder %s15_s7, %s15_s7 }
   0x4   :  { %p51_p0 = scmp.ne.s32.totalorder %s15_s7, %s50_s8  ;;  %p56_p2 = scmp.lt.s32.totalorder %s50_s8, %s50_s8 }
   0x6   :  { %p57_p3 = por %p56_p2, %p55_p1 }
   0x8   :  { %p58_p4 = pnand %p57_p3, %p51_p0 }
   0xa   :  { %61 = shalt.err (!%p58_p4)
}
   0xb   :  { %17 = dma.hbm_to_vmem [thread:$0]  %s104_s0, 256, %s15_s7, [#allocation3]  }
   0xc   :  { %82 = dma.done.wait [#allocation3], 256  }
   0xd   :  { %83 = vsyncadd [#allocation3], 4294967040  ;;  %s87_s11 = smov [#allocation5]   ;;  %v21_v0 = vld [vmem:[#allocation2] sm:$0xff]  ;;  %v22_v1 = vld [vmem:[#allocation2 + $0x8] sm:$0xff] }
   0xe   :  { %s31_s12 = sshll.u32 %s87_s11, 4  ;;  %23 = vst [vmem:[#allocation5] sm:$0xff] %v21_v0  ;;  %24 = vst [vmem:[#allocation5 + $0x8] sm:$0xff] %v22_v1  ;;  %s32_s12 = int_to_ptr.vmem [resolvable:$true] %s31_s12 }
   0xf   :  { %s62_s13 = scalar_lea.vmem %s32_s12, 256  ;;  %p67_p6 = scmp.lt.s32.totalorder %s32_s12, %s32_s12 }
  0x10   :  { %p63_p5 = scmp.ne.s32.totalorder %s32_s12, %s62_s13  ;;  %p68_p7 = scmp.lt.s32.totalorder %s62_s13, %s62_s13 }
  0x12   :  { %p69_p8 = por %p68_p7, %p67_p6 }
  0x14   :  { %p70_p9 = pnand %p69_p8, %p63_p5 }
  0x16   :  { %73 = shalt.err (!%p70_p9)
}
  0x17   :  { %34 = dma.vmem_to_hbm [thread:$0]  %s32_s12, 256, %s105_s1, [#allocation4]  }
  0x18   :  { %84 = dma.done.wait [#allocation4], 256  }
  0x19   :  { %85 = vsyncadd [#allocation4], 4294967040 }
  0x1a   :  { %38 = vsyncpa [#allocation3], 1 }
  0x1b   :  { %39 = vsyncpa [#allocation4], 1 }

</bundles_post_ra>
